<compile_context>
chip_gen: v5e
topology: v5e:2x2
jax: 0.10.0
libtpu: 0.0.40
codegen_flags: <defaults>
</compile_context>

<pallas_src>
import functools
import math

import jax
import jax.numpy as jnp
from jax.experimental import pallas as pl
from jax.experimental.pallas import tpu as pltpu


# ---------------------------------------------------------------------------
# Hardware-aware sizing helpers.
# ---------------------------------------------------------------------------

def _round_up(v, m):
    return -(-v // m) * m


def _cdiv(a, b):
    return -(-a // b)


@functools.lru_cache(maxsize=1)
def _vmem_capacity_bytes():
    try:
        return int(pltpu.get_tpu_info().vmem_capacity_bytes)
    except Exception:
        return 64 * 1024 * 1024          # conservative (v7x-sized) fallback


@functools.lru_cache(maxsize=1)
def _is_small_vmem_part():
    # v7x: 64 MiB VMEM per TensorCore, 2 TCs per chip.  v5e/v6e: 128 MiB, 1 TC.
    return _vmem_capacity_bytes() < 96 * 1024 * 1024


@functools.lru_cache(maxsize=1)
def _min_parallel_steps():
    # Give both v7x TensorCores work; 1-step grids leave a core idle.
    return 2 if _is_small_vmem_part() else 1


@functools.lru_cache(maxsize=1)
def _vmem_limit_bytes():
    vmem = _vmem_capacity_bytes()
    if _is_small_vmem_part():
        # v7x: 48 MiB scoped limit (blocks + temporaries comfortably < 64 MiB).
        return int(min(48 * 1024 * 1024, (3 * vmem) // 4))
    # v5e/v6e (128 MiB physical): plenty of headroom for Buffered(3) inputs.
    return int(vmem // 2)


def _target_block_elems(itemsize):
    """Elements per block: byte-budgeted on HBM traffic (dtype-aware) and
    capped so the in-kernel f32 working set stays inside scoped VMEM."""
    if _is_small_vmem_part():
        io_target = 6 << 20       # v7x: ~3.2 TB/s HBM; amortize ~0.35us/step
        work_cap = 8 << 20        # f32 temporaries cap (x ~3 live copies)
    else:
        io_target = 4 << 20       # measured 85-86% roofline plateau on v5e/v6e
        work_cap = 16 << 20
    elems = io_target // max(itemsize, 1)
    return int(max(8 * 128, min(elems, work_cap // 4)))


def _compiler_params(semantics):
    return pltpu.CompilerParams(
        dimension_semantics=semantics,
        vmem_limit_bytes=_vmem_limit_bytes(),
    )


def _x_block_spec(block_shape, index_map):
    """Activation input BlockSpec; 3-deep pipelining where VMEM is plentiful."""
    if (not _is_small_vmem_part()) and hasattr(pl, "Buffered"):
        try:
            return pl.BlockSpec(block_shape, index_map,
                                pipeline_mode=pl.Buffered(3))
        except TypeError:
            pass
    return pl.BlockSpec(block_shape, index_map)


def _sublane_multiple(itemsize):
    # dtype-native sublane tile: 8 for f32, 16 for bf16, 32 for int8/fp8.
    return max(8, 32 // max(itemsize, 1))


def _pick_row_tile(lane_width, rows, itemsize):
    """Row tile for a (rows, lane_width) view."""
    sub = _sublane_multiple(itemsize)
    lanes_phys = _round_up(max(lane_width, 1), 128)
    tr = _target_block_elems(itemsize) // lanes_phys
    tr = max(sub, (tr // sub) * sub)
    if tr >= rows:
        tr = rows                            # full extent: always legal
        if _min_parallel_steps() > 1 and rows > sub:
            half = _round_up(_cdiv(rows, 2), sub)
            if half < rows:
                tr = half                    # >= 2 parallel steps for 2 TCs
    return tr


def _pick_cf_tiles(b, c, s, itemsize):
    """(batch, spatial) tile for a (B, C, S) view (spatial lane-dense)."""
    sub = _sublane_multiple(itemsize)
    c_phys = _round_up(max(c, 1), sub)
    s_phys = _round_up(max(s, 1), 128)
    budget = _target_block_elems(itemsize)
    if c_phys * s_phys >= budget:
        ts = budget // c_phys
        ts = max(128, (ts // 128) * 128)
        if ts >= s:
            ts = s
        tb = 1
    else:
        ts = s
        tb = max(1, budget // (c_phys * s_phys))
        if tb >= b:
            tb = b
    # v7x: make sure both TensorCores get at least one grid step.
    if _min_parallel_steps() > 1 and _cdiv(b, tb) * _cdiv(s, ts) < 2:
        if b >= 2:
            tb = _cdiv(b, 2)
        elif s >= 256:
            ts = _round_up(_cdiv(s, 2), 128)
    return tb, ts


# ---------------------------------------------------------------------------
# Kernels.
# ---------------------------------------------------------------------------

def _ln_channels_first_kernel(x_ref, w_ref, b_ref, o_ref, *, eps):
    # x_ref: (TB, C, TS) block -- spatial lane-dense, reduce over C (sublanes).
    x = x_ref[...].astype(jnp.float32)
    u = jnp.mean(x, axis=1, keepdims=True)             # (TB, 1, TS)
    xc = x - u
    s = jnp.mean(xc * xc, axis=1, keepdims=True)       # biased variance
    inv = jax.lax.rsqrt(s + eps)
    w = w_ref[...].astype(jnp.float32)                  # (1, C, 1), resident
    b = b_ref[...].astype(jnp.float32)
    o_ref[...] = (xc * inv * w + b).astype(o_ref.dtype)


def _seg_sum_mxu(x, m):
    """Segmented lane sums via the (idle) MXU: x (TR, L) f32, m (L, L) bf16
    block-diagonal ones.  f32 hi/lo split keeps the result ~f32-accurate with
    only 2 bf16 matmuls (m is exactly representable in bf16)."""
    hi = x.astype(jnp.bfloat16)
    lo = (x - hi.astype(jnp.float32)).astype(jnp.bfloat16)
    s = jnp.dot(hi, m, preferred_element_type=jnp.float32)
    return s + jnp.dot(lo, m, preferred_element_type=jnp.float32)


def _ln_packed_kernel(x_ref, w_ref, b_ref, m_ref, o_ref, *, eps, seg):
    # x_ref: (TR, L) block; each group of `seg` consecutive lanes is one
    # LayerNorm row.  Fully lane-dense loads/stores; reductions on the MXU.
    x = x_ref[...].astype(jnp.float32)
    m = m_ref[...]                                       # (L, L) bf16, resident
    inv_seg = jnp.float32(1.0 / seg)
    u = _seg_sum_mxu(x, m) * inv_seg
    xc = x - u
    var = _seg_sum_mxu(xc * xc, m) * inv_seg
    inv = jax.lax.rsqrt(var + eps)
    w = w_ref[...].astype(jnp.float32)                   # (1, L) tiled weight
    b = b_ref[...].astype(jnp.float32)
    o_ref[...] = (xc * inv * w + b).astype(o_ref.dtype)


def _ln_lastdim_kernel(x_ref, w_ref, b_ref, o_ref, *, eps):
    # x_ref: (TR, C) block, reduce over the lane axis C.
    x = x_ref[...].astype(jnp.float32)
    u = jnp.mean(x, axis=-1, keepdims=True)
    xc = x - u
    s = jnp.mean(xc * xc, axis=-1, keepdims=True)
    inv = jax.lax.rsqrt(s + eps)
    w = w_ref[...].astype(jnp.float32)
    b = b_ref[...].astype(jnp.float32)
    o_ref[...] = (xc * inv * w + b).astype(o_ref.dtype)


# ---------------------------------------------------------------------------
# pallas_call wrappers.
# ---------------------------------------------------------------------------

_MAX_PACKED_WIDTH = 512        # cap lcm(C,128) slab width (bounds MXU work)


@functools.lru_cache(maxsize=8)
def _segment_ones(seg, width):
    i = jnp.arange(width, dtype=jnp.int32)
    m = (i[:, None] // seg) == (i[None, :] // seg)
    return m.astype(jnp.bfloat16)


def _layernorm_channels_first(x, weight, bias, eps):
    """x: (B, C, *spatial).  Normalize over axis 1 without any transpose."""
    b, c = int(x.shape[0]), int(x.shape[1])
    s = 1
    for d in x.shape[2:]:
        s *= int(d)
    x3 = x.reshape(b, c, s)                 # free reshape of contiguous data
    w3 = jnp.asarray(weight, jnp.float32).reshape(1, c, 1)
    b3 = jnp.asarray(bias, jnp.float32).reshape(1, c, 1)
    itemsize = jnp.dtype(x.dtype).itemsize
    tb, ts = _pick_cf_tiles(b, c, s, itemsize)
    grid = (_cdiv(b, tb), _cdiv(s, ts))
    out = pl.pallas_call(
        functools.partial(_ln_channels_first_kernel, eps=eps),
        out_shape=jax.ShapeDtypeStruct((b, c, s), x.dtype),
        grid_spec=pltpu.PrefetchScalarGridSpec(
            num_scalar_prefetch=0,
            grid=grid,
            in_specs=[
                _x_block_spec((tb, c, ts), lambda bi, si: (bi, 0, si)),
                pl.BlockSpec((1, c, 1), lambda bi, si: (0, 0, 0)),
                pl.BlockSpec((1, c, 1), lambda bi, si: (0, 0, 0)),
            ],
            out_specs=pl.BlockSpec((tb, c, ts), lambda bi, si: (bi, 0, si)),
        ),
        compiler_params=_compiler_params(("parallel", "parallel")),
    )(x3, w3, b3)
    return out.reshape(x.shape)


def _packed_call(x2d, w_t, b_t, eps, seg):
    """x2d: (r2, L) lane-dense slab view, each group of `seg` lanes is a row."""
    r2, L = int(x2d.shape[0]), int(x2d.shape[1])
    itemsize = jnp.dtype(x2d.dtype).itemsize
    tr = _pick_row_tile(L, r2, itemsize)
    m = _segment_ones(seg, L)
    return pl.pallas_call(
        functools.partial(_ln_packed_kernel, eps=eps, seg=seg),
        out_shape=jax.ShapeDtypeStruct((r2, L), x2d.dtype),
        grid_spec=pltpu.PrefetchScalarGridSpec(
            num_scalar_prefetch=0,
            grid=(_cdiv(r2, tr),),
            in_specs=[
                _x_block_spec((tr, L), lambda i: (i, 0)),
                pl.BlockSpec((1, L), lambda i: (0, 0)),
                pl.BlockSpec((1, L), lambda i: (0, 0)),
                pl.BlockSpec((L, L), lambda i: (0, 0)),
            ],
            out_specs=pl.BlockSpec((tr, L), lambda i: (i, 0)),
        ),
        compiler_params=_compiler_params(("parallel",)),
    )(x2d, w_t, b_t, m)


def _general_call(x2, w2, b2, eps):
    """x2: (rows, C), C on lanes."""
    rows, c = int(x2.shape[0]), int(x2.shape[1])
    itemsize = jnp.dtype(x2.dtype).itemsize
    tr = _pick_row_tile(c, rows, itemsize)
    return pl.pallas_call(
        functools.partial(_ln_lastdim_kernel, eps=eps),
        out_shape=jax.ShapeDtypeStruct((rows, c), x2.dtype),
        grid_spec=pltpu.PrefetchScalarGridSpec(
            num_scalar_prefetch=0,
            grid=(_cdiv(rows, tr),),
            in_specs=[
                _x_block_spec((tr, c), lambda i: (i, 0)),
                pl.BlockSpec((1, c), lambda i: (0, 0)),
                pl.BlockSpec((1, c), lambda i: (0, 0)),
            ],
            out_specs=pl.BlockSpec((tr, c), lambda i: (i, 0)),
        ),
        compiler_params=_compiler_params(("parallel",)),
    )(x2, w2, b2)


def _layernorm_channels_last(x, weight, bias, eps, packed_wb=None):
    """x: (..., C).  Normalize over the last axis."""
    c = int(x.shape[-1])
    rows = 1
    for d in x.shape[:-1]:
        rows *= int(d)
    x2 = x.reshape(rows, c)

    if c < 128:
        L = math.lcm(c, 128)
        if L <= _MAX_PACKED_WIDTH:
            g = L // c
            bulk = (rows // g) * g
            if bulk == rows or bulk >= 4 * g:
                if packed_wb is not None:
                    w_t, b_t = packed_wb(g, L)
                else:
                    w_t = jnp.tile(jnp.asarray(weight, jnp.float32).reshape(-1),
                                   g).reshape(1, L)
                    b_t = jnp.tile(jnp.asarray(bias, jnp.float32).reshape(-1),
                                   g).reshape(1, L)
                if bulk == rows:
                    out = _packed_call(x2.reshape(rows // g, L), w_t, b_t, eps, c)
                    return out.reshape(x.shape)
                # Ragged row count: lane-dense packed kernel on the divisible
                # bulk, tiny masked call for the tail.
                yb = _packed_call(x2[:bulk].reshape(bulk // g, L),
                                  w_t, b_t, eps, c)
                w2 = jnp.asarray(weight, jnp.float32).reshape(1, c)
                b2 = jnp.asarray(bias, jnp.float32).reshape(1, c)
                yt = _general_call(x2[bulk:], w2, b2, eps)
                out = jnp.concatenate([yb.reshape(bulk, c), yt], axis=0)
                return out.reshape(x.shape)

    # General path: C on the lane axis (lane-dense when C >= 128; correctness
    # fallback for awkward shapes / very large lcm).
    w2 = jnp.asarray(weight, jnp.float32).reshape(1, c)
    b2 = jnp.asarray(bias, jnp.float32).reshape(1, c)
    return _general_call(x2, w2, b2, eps).reshape(x.shape)


# ---------------------------------------------------------------------------
# Module.
# ---------------------------------------------------------------------------

class LayerNorm:
    """JAX/Pallas port of the PyTorch LayerNorm module (channels_last /
    channels_first, single normalized dim of size `normalized_shape`)."""

    def __init__(self, normalized_shape, eps=1e-6, data_format="channels_last"):
        if data_format not in ("channels_last", "channels_first"):
            raise NotImplementedError
        self.weight = jnp.ones((normalized_shape,), jnp.float32)
        self.bias = jnp.zeros((normalized_shape,), jnp.float32)
        self.eps = eps
        self.data_format = data_format
        self.normalized_shape = (normalized_shape,)
        self._packed_cache = None    # cached lane-tiled weight/bias

    def _packed_wb(self, g, L):
        key = (id(self.weight), id(self.bias), g, L)
        if self._packed_cache is None or self._packed_cache[0] != key:
            w = jnp.tile(jnp.asarray(self.weight, jnp.float32).reshape(-1),
                         g).reshape(1, L)
            b = jnp.tile(jnp.asarray(self.bias, jnp.float32).reshape(-1),
                         g).reshape(1, L)
            self._packed_cache = (key, w, b)
        return self._packed_cache[1], self._packed_cache[2]

    def __call__(self, x):
        c = self.normalized_shape[0]
        if self.data_format == "channels_last":
            assert x.shape[-1] == c
            return _layernorm_channels_last(x, self.weight, self.bias, self.eps,
                                            packed_wb=self._packed_wb)
        else:  # channels_first: (B, C, *spatial), normalize over axis 1
            assert x.shape[1] == c
            return _layernorm_channels_first(x, self.weight, self.bias, self.eps)


# ---------------------------------------------------------------------------
# Pure-JAX references + self-test.
# ---------------------------------------------------------------------------

def _reference_channels_first(x, w, b, eps):
    xf = x.astype(jnp.float32)
    u = jnp.mean(xf, axis=1, keepdims=True)
    s = jnp.mean((xf - u) ** 2, axis=1, keepdims=True)
    xn = (xf - u) / jnp.sqrt(s + eps)
    shape = (1, x.shape[1]) + (1,) * (x.ndim - 2)
    return w.reshape(shape) * xn + b.reshape(shape)


def _reference_channels_last(x, w, b, eps):
    xf = x.astype(jnp.float32)
    u = jnp.mean(xf, axis=-1, keepdims=True)
    s = jnp.mean((xf - u) ** 2, axis=-1, keepdims=True)
    xn = (xf - u) / jnp.sqrt(s + eps)
    return xn * w + b


if __name__ == "__main__":
    key = jax.random.PRNGKey(0)
    k1, k2, k3, k4, k5 = jax.random.split(key, 5)

    C = 4

    # ---- channels_first: (B, C, D, H, W), f32 ----
    x_cf = jax.random.normal(k1, (2, C, 8, 8, 8), jnp.float32)
    ln_cf = LayerNorm(C, eps=1e-6, data_format="channels_first")
    ln_cf.weight = 1.0 + 0.1 * jnp.arange(C, dtype=jnp.float32)
    ln_cf.bias = 0.05 * jnp.arange(C, dtype=jnp.float32)
    y_cf = jax.block_until_ready(ln_cf(x_cf))
    y_cf_ref = _reference_channels_first(x_cf, ln_cf.weight, ln_cf.bias, ln_cf.eps)
    assert y_cf.shape == x_cf.shape
    assert jnp.allclose(y_cf, y_cf_ref, atol=1e-4, rtol=1e-4)

    # ---- channels_last, small C: lane-packed MXU-reduction path ----
    x_cl = jax.random.normal(k2, (2, 8, 8, 8, C), jnp.float32)
    ln_cl = LayerNorm(C, eps=1e-6, data_format="channels_last")
    ln_cl.weight = 1.0 - 0.05 * jnp.arange(C, dtype=jnp.float32)
    ln_cl.bias = -0.02 * jnp.arange(C, dtype=jnp.float32)
    y_cl = jax.block_until_ready(ln_cl(x_cl))
    y_cl_ref = _reference_channels_last(x_cl, ln_cl.weight, ln_cl.bias, ln_cl.eps)
    assert y_cl.shape == x_cl.shape
    assert jnp.allclose(y_cl, y_cl_ref, atol=1e-4, rtol=1e-4)

    # ---- channels_last, C=48 (non power of 2): lcm(48,128)=384 packed slab ----
    C2 = 48
    x_cl2 = jax.random.normal(k3, (2, 4, 4, C2), jnp.float32)
    ln_cl2 = LayerNorm(C2, eps=1e-6, data_format="channels_last")
    ln_cl2.weight = 1.0 + 0.01 * jnp.arange(C2, dtype=jnp.float32)
    ln_cl2.bias = 0.03 - 0.001 * jnp.arange(C2, dtype=jnp.float32)
    y_cl2 = jax.block_until_ready(ln_cl2(x_cl2))
    y_cl2_ref = _reference_channels_last(x_cl2, ln_cl2.weight, ln_cl2.bias, ln_cl2.eps)
    assert y_cl2.shape == x_cl2.shape
    assert jnp.allclose(y_cl2, y_cl2_ref, atol=1e-4, rtol=1e-4)

    # ---- channels_last, ragged row count: packed bulk + tiny tail call ----
    x_cl3 = jax.random.normal(k4, (2, 9, 8, C), jnp.float32)   # rows=144, g=32
    ln_cl3 = LayerNorm(C, eps=1e-6, data_format="channels_last")
    ln_cl3.weight = 1.0 + 0.07 * jnp.arange(C, dtype=jnp.float32)
    ln_cl3.bias = 0.01 * jnp.arange(C, dtype=jnp.float32)
    y_cl3 = jax.block_until_ready(ln_cl3(x_cl3))
    y_cl3_ref = _reference_channels_last(x_cl3, ln_cl3.weight, ln_cl3.bias, ln_cl3.eps)
    assert y_cl3.shape == x_cl3.shape
    assert jnp.allclose(y_cl3, y_cl3_ref, atol=1e-4, rtol=1e-4)

    # ---- channels_first, bf16 input (dtype-aware tiling path) ----
    x_bf = jax.random.normal(k5, (2, C, 4, 4, 4), jnp.float32).astype(jnp.bfloat16)
    ln_bf = LayerNorm(C, eps=1e-6, data_format="channels_first")
    y_bf = jax.block_until_ready(ln_bf(x_bf))
    y_bf_ref = _reference_channels_first(x_bf, ln_bf.weight, ln_bf.bias, ln_bf.eps)
    assert y_bf.shape == x_bf.shape and y_bf.dtype == jnp.bfloat16
    assert jnp.allclose(y_bf.astype(jnp.float32), y_bf_ref, atol=2e-2, rtol=2e-2)

    print("KERNEL_OK")
</pallas_src>

<mosaic_0001>
module attributes {stable_mosaic.version = 11 : i64} {
  func.func @_ln_channels_first_kernel(%arg0: i32, %arg1: i32, %arg2: memref<1x4x512xf32, #tpu.memory_space<vmem>>, %arg3: memref<1x4x1xf32, #tpu.memory_space<vmem>>, %arg4: memref<1x4x1xf32, #tpu.memory_space<vmem>>, %arg5: memref<1x4x512xf32, #tpu.memory_space<vmem>>) attributes {dimension_semantics = [#tpu.dimension_semantics<parallel>, #tpu.dimension_semantics<parallel>], iteration_bounds = array<i64: 2, 1>, scalar_prefetch = 0 : i64, scratch_operands = 0 : i64, tpu.core_type = #tpu.core_type<tc>, window_params = [{transform_indices = @transform_0, window_bounds = array<i64: 1, 4, 512>}, {pipeline_mode = #tpu.pipeline_mode<synchronous>, transform_indices = @transform_1, window_bounds = array<i64: 1, 4, 1>}, {pipeline_mode = #tpu.pipeline_mode<synchronous>, transform_indices = @transform_2, window_bounds = array<i64: 1, 4, 1>}, {transform_indices = @transform_3, window_bounds = array<i64: 1, 4, 512>}]} {
    %c0 = arith.constant 0 : index
    %c0_0 = arith.constant 0 : index
    %c0_1 = arith.constant 0 : index
    %0 = vector.load %arg2[%c0, %c0_0, %c0_1] : memref<1x4x512xf32, #tpu.memory_space<vmem>>, vector<1x4x512xf32>
    %cst = arith.constant dense<0.000000e+00> : vector<1x512xf32>
    %1 = vector.multi_reduction <add>, %0, %cst [1] : vector<1x4x512xf32> to vector<1x512xf32>
    %2 = vector.shape_cast %1 : vector<1x512xf32> to vector<1x1x512xf32>
    %cst_2 = arith.constant 4.000000e+00 : f32
    %3 = vector.broadcast %cst_2 : f32 to vector<1x1x512xf32>
    %4 = arith.divf %2, %3 : vector<1x1x512xf32>
    %5 = vector.broadcast %4 : vector<1x1x512xf32> to vector<1x4x512xf32>
    %6 = arith.subf %0, %5 : vector<1x4x512xf32>
    %7 = arith.mulf %6, %6 : vector<1x4x512xf32>
    %cst_3 = arith.constant dense<0.000000e+00> : vector<1x512xf32>
    %8 = vector.multi_reduction <add>, %7, %cst_3 [1] : vector<1x4x512xf32> to vector<1x512xf32>
    %9 = vector.shape_cast %8 : vector<1x512xf32> to vector<1x1x512xf32>
    %cst_4 = arith.constant 4.000000e+00 : f32
    %10 = vector.broadcast %cst_4 : f32 to vector<1x1x512xf32>
    %11 = arith.divf %9, %10 : vector<1x1x512xf32>
    %cst_5 = arith.constant 9.99999997E-7 : f32
    %12 = vector.broadcast %cst_5 : f32 to vector<1x1x512xf32>
    %13 = arith.addf %11, %12 : vector<1x1x512xf32>
    %14 = math.rsqrt %13 : vector<1x1x512xf32>
    %c0_6 = arith.constant 0 : index
    %c0_7 = arith.constant 0 : index
    %c0_8 = arith.constant 0 : index
    %15 = vector.load %arg3[%c0_6, %c0_7, %c0_8] : memref<1x4x1xf32, #tpu.memory_space<vmem>>, vector<1x4x1xf32>
    %c0_9 = arith.constant 0 : index
    %c0_10 = arith.constant 0 : index
    %c0_11 = arith.constant 0 : index
    %16 = vector.load %arg4[%c0_9, %c0_10, %c0_11] : memref<1x4x1xf32, #tpu.memory_space<vmem>>, vector<1x4x1xf32>
    %17 = vector.broadcast %14 : vector<1x1x512xf32> to vector<1x4x512xf32>
    %18 = arith.mulf %6, %17 : vector<1x4x512xf32>
    %19 = vector.broadcast %15 : vector<1x4x1xf32> to vector<1x4x512xf32>
    %20 = arith.mulf %18, %19 : vector<1x4x512xf32>
    %21 = vector.broadcast %16 : vector<1x4x1xf32> to vector<1x4x512xf32>
    %22 = arith.addf %20, %21 : vector<1x4x512xf32>
    %c0_12 = arith.constant 0 : index
    %c0_13 = arith.constant 0 : index
    %c0_14 = arith.constant 0 : index
    %23 = vector.load %arg5[%c0_12, %c0_13, %c0_14] : memref<1x4x512xf32, #tpu.memory_space<vmem>>, vector<1x4x512xf32>
    tpu.vector_store %arg5[%c0_12, %c0_13, %c0_14], %22 {strides = array<i32>} : memref<1x4x512xf32, #tpu.memory_space<vmem>>, vector<1x4x512xf32>,
    return
  }
  func.func @transform_0(%arg0: i32, %arg1: i32) -> (i32, i32, i32) {
    %c0_i32 = arith.constant 0 : i32
    %c0_i32_0 = arith.constant 0 : i32
    return %arg0, %c0_i32, %arg1 : i32, i32, i32
  }
  func.func @transform_1(%arg0: i32, %arg1: i32) -> (i32, i32, i32) {
    %c0_i32 = arith.constant 0 : i32
    %c0_i32_0 = arith.constant 0 : i32
    %c0_i32_1 = arith.constant 0 : i32
    %c0_i32_2 = arith.constant 0 : i32
    return %c0_i32, %c0_i32_0, %c0_i32_1 : i32, i32, i32
  }
  func.func @transform_2(%arg0: i32, %arg1: i32) -> (i32, i32, i32) {
    %c0_i32 = arith.constant 0 : i32
    %c0_i32_0 = arith.constant 0 : i32
    %c0_i32_1 = arith.constant 0 : i32
    %c0_i32_2 = arith.constant 0 : i32
    return %c0_i32, %c0_i32_0, %c0_i32_1 : i32, i32, i32
  }
  func.func @transform_3(%arg0: i32, %arg1: i32) -> (i32, i32, i32) {
    %c0_i32 = arith.constant 0 : i32
    %c0_i32_0 = arith.constant 0 : i32
    return %arg0, %c0_i32, %arg1 : i32, i32, i32
  }
}

</mosaic_0001>

<bundles_post_ra>
// kernel: tpu_custom_call.1
= control target key start
LH: loop header
LB: loop body
LE: loop exit
PB: predicated region body
PF: predicated region fallthrough
CT: control target
= control target key end

     0   :  { %8 = vsyncpa [#allocation3], 0  ;;  %s896_s0 = inlined_call_operand.hbm [shape: f32[2,4,512], index: 0, kind: input, shape index: {}]   ;;  %s897_s1 = inlined_call_operand.vmem [shape: f32[1,4,1], index: 1, kind: input, shape index: {}]   ;;  %s898_s2 = inlined_call_operand.vmem [shape: f32[1,4,1], index: 2, kind: input, shape index: {}]   ;;  %s899_s3 = inlined_call_operand.hbm [shape: f32[2,4,512], index: 3, kind: output, shape index: {}]  }
   0x1   :  { %10 = vsyncpa [#allocation3 + $0x1], 0 }
   0x2   :  { %11 = vsyncpa [#allocation4], 0 }
   0x3   :  { %13 = vsyncpa [#allocation4 + $0x1], 0  ;;  %s738_s12 = smov 0   ;;  %s740_s13 = smov 0  }
   0x4   :  { %s742_s14 = smov 0   ;;  %s744_s15 = smov 0  }
   0x5   :  { %s746_s16 = smov 0   ;;  %s748_s17 = smov 0  }
   0x6 LB: > { %s508_s18 = sadd.s32 4294967295, %s713_s17   ;;  %s509_s19 = sadd.s32 4294967294, %s713_s17   ;;  %s713_s17 = sphi %s748_s17, %s19_s17   ;;  %s709_s16 = sphi %s746_s16, %s910_s16   ;;  %s705_s15 = sphi %s744_s15, %s909_s15   ;;  %s701_s14 = sphi %s742_s14, %s908_s14   ;;  %s697_s13 = sphi %s740_s13, %s907_s13   ;;  %s693_s12 = sphi %s738_s12, %s906_s12  }
   0x7   : > { %s31_s20 = sadd.s32 1, %s709_s16  ;;  %s40_s21 = sadd.s32 1, %s701_s14 }
   0x8   : > { %p33_p0 = scmp.ge.s32.totalorder %s31_s20, 2  ;;  %p47_p1 = scmp.ne.s32.totalorder %s701_s14, %s697_s13 }
   0x9   : > { %p48_p2 = scmp.eq.s32.totalorder %s713_s17, 0  ;;  %p53_p3 = scmp.ne.s32.totalorder %s697_s13, %s693_s12 }
   0xa   : > { %s912_s20 = smov (%p33_p0, %s31_s20), 0  ;;  %p54_p5 = scmp.eq.s32.totalorder %s508_s18, 0 }
   0xb   : > { %p779_p4 = por %p48_p2, %p47_p1  ;;  %s35_s23 = ssub.s32 %s709_s16, %s912_s20 }
   0xc   : > { %p121_p6 = scmp.eq.s32.totalorder %s508_s18, 1  ;;  %p38_p7 = scmp.eq.s32.totalorder %s35_s23, 0 }
   0xd   : > { %p785_p8 = por %p54_p5, %p53_p3  ;;  %p127_p10 = scmp.eq.s32.totalorder %s509_s19, 1 }
   0xe   : > { %p789_p9 = por %p121_p6, %p47_p1  ;;  %p511_p12 = scmp.ge.s32.totalorder %s713_s17, 2 }
   0xf   : > { %s794_s26 = scalar_select %p38_p7, %s701_s14, %s40_s21  }
  0x10   : > { %p796_p11 = por %p127_p10, %p53_p3  ;;  %p537_p13 = scmp.lt.s32.totalorder %s713_s17, 2 }
  0x11   : > { %s153_s28 = sand.u32 1, %s701_s14   ;;  %s523_s30 = sshll.u32 %s709_s16, 4 }
  0x12   : > { %s512_s29 = sshll.u32 %s153_s28, 4  ;;  %s164_s6 = scalar_lea.hbm %s896_s0, %s523_s30 }
  0x13   : > { %s157_s7 = scalar_lea.vmem [#allocation2], %s512_s29  ;;  %s166_s9 = sshll.u32 %s164_s6, 4  ;;  %s167_s9 = int_to_ptr.hbm [resolvable:$true] %s166_s9 }
  0x14   : > { %s168_s8 = sshll.u32 %s157_s7, 4  ;;  %p530_p0 = pnand %p537_p13, %p779_p4  ;;  %s169_s8 = int_to_ptr.vmem [resolvable:$true] %s168_s8 }
  0x15   : > { %p515_p1 = scmp.ge.s32.totalorder %s713_s17, 1  ;;  %p173_p2 = scmp.lt.s32.totalorder %s713_s17, 3 }
  0x16   : > { %s154_s10 = scalar_lea.sflag [#allocation3], %s153_s28 }
  0x17   : > { %532 = dma.hbm_to_vmem [thread:$0]  (!%p530_p0), %s167_s9, 256, %s169_s8, %s154_s10  }
  0x18   : > { %p174_p3 = pnand %p515_p1, %p173_p2 }
  0x19   : > { %s812_s11 = sand.u32 (!%p174_p3), 1, %s697_s13  }
  0x1a   : > { %177 = sbr.rel (%p174_p3) target bundleno = 165 (0xa5), region = 32  ;;  %s516_s18 = sshll.u32 (!%p174_p3), %s812_s11, 4 }
  0x1b   : > { %s180_s19 = scalar_lea.sflag (!%p174_p3), [#allocation3], %s812_s11  ;;  %s183_s21 = scalar_lea.vmem (!%p174_p3), [#allocation2], %s516_s18 }
  0x1f   : > { %684 = dma.done.wait (%p785_p8), %s180_s19, 256  }
  0x20   : > { %686 = vsyncadd (%p785_p8), %s180_s19, 4294967040  ;;  %v715_v0 = vmov 0   ;;  %v367_v1 = vld [vmem:[%s897_s1] sm:$0xf]  ;;  %v716_v2 = vmov 4.0   ;;  %v209_v4 = vld [vmem:[%s183_s21] sm:$0xff] }
  0x21   : > { %590 = vset.pattern.permute.xlu0 %v715_v0  ;;  %591 = vrcp.f32 %v716_v2  ;;  %v368_v3 = vld [vmem:[%s898_s2] sm:$0xf]  ;;  %213 = vst [vmem:[#allocation1] ss:$2 sm:$0xff] %v209_v4  ;;  %vm224_vm0 = vcmask 1043456   ;;  %s524_s24 = sshll.u32 %s705_s15, 4 }
  0x22   : > { %383 = vperm.xlu0 %590, %v367_v1   ;;  %v210_v5 = vld [vmem:[%s183_s21 + $0x8] sm:$0xff]  ;;  %s419_s5 = scalar_lea.hbm %s899_s3, %s524_s24  ;;  %s206_s6 = scalar_lea.vmem [#allocation5], %s516_s18 }
  0x23   : > { %215 = vst [vmem:[#allocation1 + $0x10] ss:$2 sm:$0xff] %v210_v5  ;;  %s421_s7 = sshll.u32 %s206_s6, 4  ;;  %s423_s8 = sshll.u32 %s419_s5, 4  ;;  %s422_s7 = int_to_ptr.vmem [resolvable:$true] %s421_s7  ;;  %s424_s8 = int_to_ptr.hbm [resolvable:$true] %s423_s8 }
  0x24   : > { %s406_s15 = scalar_lea.sflag [#allocation4], %s812_s11  ;;  %s645_s9 = sshra.s32 %s424_s8, 4  ;;  %s646_s9 = int_to_ptr.hbm [resolvable:$true] %s645_s9 }
  0x25   : > { %s647_s10 = scalar_lea.hbm %s646_s9, 16  ;;  %s651_s18 = scalar_lea.hbm %s899_s3, 32 }
  0x26   : > { %p648_p4 = scmp.ne.s32.totalorder %s646_s9, %s647_s10  ;;  %p652_p7 = scmp.lt.s32.totalorder %s646_s9, %s899_s3 }
  0x27   : > { %v592_v6 = vpop.eup %591  ;;  %p653_p8 = scmp.lt.s32.totalorder %s651_s18, %s647_s10 }
  0x28   : > { %v254_v7 = vmul.f32 4.0, %v592_v6  ;;  %v217_v9 = vld.sshfl [vmem:[#allocation1 + $0x8] sm:$0xff pattern:$0x75316420]  ;;  %vm258_vm1 = vweird.f32 %v592_v6  ;;  %p649_p5 = pnand %p648_p4, %p789_p9 }
  0x29   : > { %v232_v11 = vsel %vm224_vm0, %v217_v9, 0.0  ;;  %v216_v12 = vld.sshfl [vmem:[#allocation1] sm:$0xff pattern:$0x75316420]  ;;  %p654_p10 = por %p653_p8, %p652_p7 }
  0x2a   : > { %394 = vperm.xlu0 %590, %v368_v3   ;;  %v255_v8 = vsub.f32 1.0, %v254_v7  ;;  %v219_v10 = vld.sshfl [vmem:[#allocation1 + $0x18] sm:$0xff pattern:$0x75316420]  ;;  %v225_v14 = vsel %vm224_vm0, %v216_v12, 0.0  ;;  %v233_v15 = vrot.slane %v232_v11, 4  ;;  %p650_p6 = pneg %p649_p5 }
  0x2b   : > { %v218_v13 = vld.sshfl [vmem:[#allocation1 + $0x10] sm:$0xff pattern:$0x75316420]  ;;  %v246_v17 = vsel %vm224_vm0, %v219_v10, 0.0  ;;  %v226_v19 = vrot.slane %v225_v14, 4 }
  0x2c   : > { %v239_v16 = vsel %vm224_vm0, %v218_v13, 0.0  ;;  %v256_v18 = vmul.f32 %v592_v6, %v255_v8  ;;  %v247_v21 = vrot.slane %v246_v17, 4  ;;  %v234_v22 = vadd.f32 %v233_v15, %v232_v11  ;;  %p655_p13 = pnand %p654_p10, %p650_p6 }
  0x2d   : > { %v240_v20 = vrot.slane %v239_v16, 4  ;;  %v227_v23 = vadd.f32 %v226_v19, %v225_v14 }
  0x2e   : > { %v248_v25 = vadd.f32 %v247_v21, %v246_v17  ;;  %v235_v26 = vrot.slane %v234_v22, 2  ;;  %v257_v27 = vadd.f32 %v592_v6, %v256_v18 }
  0x2f   : > { %v241_v24 = vadd.f32 %v240_v20, %v239_v16  ;;  %v228_v28 = vrot.slane %v227_v23, 2 }
  0x30   : > { %v249_v30 = vrot.slane %v248_v25, 2  ;;  %v236_v31 = vadd.f32 %v235_v26, %v234_v22  ;;  %v259_v36 = vsel %vm258_vm1, %v592_v6, %v257_v27 }
  0x31   : > { %v242_v29 = vrot.slane %v241_v24, 2  ;;  %v229_v32 = vadd.f32 %v228_v28, %v227_v23 }
  0x32   : > { %v250_v34 = vadd.f32 %v249_v30, %v248_v25  ;;  %v237_v35 = vrot.slane %v236_v31, 1 }
  0x33   : > { %v243_v33 = vadd.f32 %v242_v29, %v241_v24  ;;  %v230_v37 = vrot.slane %v229_v32, 1 }
  0x34   : > { %v251_v39 = vrot.slane %v250_v34, 1  ;;  %v238_v40 = vadd.f32 %v237_v35, %v236_v31 }
  0x35   : > { %v244_v38 = vrot.slane %v243_v33, 1  ;;  %v231_v41 = vadd.f32 %v230_v37, %v229_v32 }
  0x36   : > { %v252_v43 = vadd.f32 %v251_v39, %v250_v34  ;;  %v261_v44 = vmul.f32 %v259_v36, %v238_v40 }
  0x37   : > { %v245_v42 = vadd.f32 %v244_v38, %v243_v33  ;;  %v260_v45 = vmul.f32 %v259_v36, %v231_v41 }
  0x38   : > { %v263_v47 = vmul.f32 %v259_v36, %v252_v43  ;;  %v268_v48 = vrot.slane %v261_v44, 4 }
  0x39   : > { %v262_v46 = vmul.f32 %v259_v36, %v245_v42 }
  0x3a   : > { %v269_v49 = vrot.slane %v263_v47, 4  ;;  %v270_v50 = vsel %vm224_vm0, %v260_v45, %v268_v48 }
  0x3b   : > { %v834_v52 = vsub.f32 %v209_v4, %v270_v50 }
  0x3c   : > { %v271_v51 = vsel %vm224_vm0, %v262_v46, %v269_v49 }
  0x3d   : > { %v836_v53 = vsub.f32 %v210_v5, %v271_v51  ;;  %v276_v54 = vmul.f32 %v834_v52, %v834_v52 }
  0x3f   : > { %v277_v55 = vmul.f32 %v836_v53, %v836_v53  ;;  %280 = vst [vmem:[#allocation1] ss:$2 sm:$0xff] %v276_v54 }
  0x41   : > { %282 = vst [vmem:[#allocation1 + $0x10] ss:$2 sm:$0xff] %v277_v55 }
  0x46   : > { %v284_v56 = vld.sshfl [vmem:[#allocation1 + $0x8] sm:$0xff pattern:$0x75316420]  ;;  %v283_v57 = vld.sshfl [vmem:[#allocation1] sm:$0xff pattern:$0x75316420] }
  0x47   : > { %v291_v60 = vsel %vm224_vm0, %v283_v57, 0.0  ;;  %v298_v61 = vsel %vm224_vm0, %v284_v56, 0.0 }
  0x48   : > { %v285_v58 = vld.sshfl [vmem:[#allocation1 + $0x10] sm:$0xff pattern:$0x75316420]  ;;  %v286_v59 = vld.sshfl [vmem:[#allocation1 + $0x18] sm:$0xff pattern:$0x75316420] }
  0x49   : > { %v305_v62 = vsel %vm224_vm0, %v285_v58, 0.0  ;;  %v292_v63 = vrot.slane %v291_v60, 4  ;;  %v299_v0 = vrot.slane %v298_v61, 4  ;;  %v312_v2 = vsel %vm224_vm0, %v286_v59, 0.0 }
  0x4a   : > { %v306_v1 = vrot.slane %v305_v62, 4  ;;  %v313_v3 = vrot.slane %v312_v2, 4 }
  0x4b   : > { %v293_v4 = vadd.f32 %v292_v63, %v291_v60  ;;  %v300_v5 = vadd.f32 %v299_v0, %v298_v61 }
  0x4c   : > { %v307_v6 = vadd.f32 %v306_v1, %v305_v62  ;;  %v314_v7 = vadd.f32 %v313_v3, %v312_v2 }
  0x4d   : > { %v294_v8 = vrot.slane %v293_v4, 2  ;;  %v301_v9 = vrot.slane %v300_v5, 2 }
  0x4e   : > { %v308_v10 = vrot.slane %v307_v6, 2  ;;  %v315_v11 = vrot.slane %v314_v7, 2 }
  0x4f   : > { %v295_v12 = vadd.f32 %v294_v8, %v293_v4  ;;  %v302_v13 = vadd.f32 %v301_v9, %v300_v5  ;;  %v717_v5 = vmov 839922192  }
  0x50   : > { %v309_v14 = vadd.f32 %v308_v10, %v307_v6  ;;  %v316_v15 = vadd.f32 %v315_v11, %v314_v7  ;;  %v386_v6 = vunpack.c.l.s4 %v717_v5 }
  0x51   : > { %v296_v16 = vrot.slane %v295_v12, 1  ;;  %v303_v17 = vrot.slane %v302_v13, 1 }
  0x52   : > { %v310_v18 = vrot.slane %v309_v14, 1  ;;  %v317_v19 = vrot.slane %v316_v15, 1  ;;  %v387_v8 = vunpack.c.0.s8 %v386_v6 }
  0x53   : > { %v297_v20 = vadd.f32 %v296_v16, %v295_v12  ;;  %v304_v21 = vadd.f32 %v303_v17, %v302_v13 }
  0x54   : > { %v311_v22 = vadd.f32 %v310_v18, %v309_v14  ;;  %v318_v23 = vadd.f32 %v317_v19, %v316_v15 }
  0x55   : > { %v319_v24 = vmul.f32 %v297_v20, %v259_v36  ;;  %v320_v25 = vmul.f32 %v304_v21, %v259_v36 }
  0x56   : > { %v321_v26 = vmul.f32 %v311_v22, %v259_v36  ;;  %v322_v27 = vmul.f32 %v318_v23, %v259_v36 }
  0x57   : > { %v323_v28 = vadd.f32 1e-06, %v319_v24  ;;  %v324_v29 = vadd.f32 1e-06, %v320_v25 }
  0x58   : > { %v325_v30 = vadd.f32 1e-06, %v321_v26  ;;  %v326_v31 = vadd.f32 1e-06, %v322_v27 }
  0x59   : > { %593 = vrsqrt.f32 %v323_v28  ;;  %vm343_vm2 = vweird.f32 %v324_v29  ;;  %vm333_vm7 = vweird.f32 %v323_v28 }
  0x5a   : > { %595 = vrsqrt.f32 %v324_v29  ;;  %vm363_vm5 = vweird.f32 %v326_v31  ;;  %vm353_vm11 = vweird.f32 %v325_v30 }
  0x5b   : > { %597 = vrsqrt.f32 %v325_v30 }
  0x5c   : > { %599 = vrsqrt.f32 %v326_v31 }
  0x5f   : > { %v594_v32 = vpop.eup %593 }
  0x60   : > { %v596_v33 = vpop.eup %595  ;;  %v328_v34 = vmul.f32 %v594_v32, %v323_v28  ;;  %vm334_vm8 = vweird.f32 %v594_v32 }
  0x61   : > { %v598_v35 = vpop.eup %597  ;;  %v338_v37 = vmul.f32 %v596_v33, %v324_v29  ;;  %vm344_vm3 = vweird.f32 %v596_v33  ;;  %vm335_vm10 = vmor %vm333_vm7, %vm334_vm8 }
  0x62   : > { %v600_v38 = vpop.eup %599  ;;  %v329_v39 = vmul.f32 %v594_v32, %v328_v34  ;;  %v348_v40 = vmul.f32 %v598_v35, %v325_v30  ;;  %vm846_vm4 = vmor %vm343_vm2, %vm344_vm3  ;;  %vm354_vm12 = vweird.f32 %v598_v35 }
  0x63   : > { %v339_v41 = vmul.f32 %v596_v33, %v338_v37  ;;  %v358_v42 = vmul.f32 %v600_v38, %v326_v31  ;;  %vm364_vm6 = vweird.f32 %v600_v38  ;;  %vm355_vm13 = vmor %vm353_vm11, %vm354_vm12 }
  0x64   : > { %v330_v43 = vmul.f32 0.5, %v329_v39  ;;  %v349_v36 = vmul.f32 %v598_v35, %v348_v40  ;;  %vm365_vm9 = vmor %vm363_vm5, %vm364_vm6 }
  0x65   : > { %v340_v44 = vmul.f32 0.5, %v339_v41  ;;  %v359_v45 = vmul.f32 %v600_v38, %v358_v42 }
  0x66   : > { %v331_v46 = vsub.f32 1.5, %v330_v43  ;;  %v350_v47 = vmul.f32 0.5, %v349_v36 }
  0x67   : > { %v341_v48 = vsub.f32 1.5, %v340_v44  ;;  %v360_v50 = vmul.f32 0.5, %v359_v45 }
  0x68   : > { %v332_v51 = vmul.f32 %v594_v32, %v331_v46  ;;  %v351_v54 = vsub.f32 1.5, %v350_v47 }
  0x69   : > { %v342_v55 = vmul.f32 %v596_v33, %v341_v48  ;;  %v361_v56 = vsub.f32 1.5, %v360_v50 }
  0x6a   : > { %v352_v57 = vmul.f32 %v598_v35, %v351_v54  ;;  %v336_v58 = vsel %vm335_vm10, %v594_v32, %v332_v51 }
  0x6b   : > { %v346_v59 = vsel %vm846_vm4, %v596_v33, %v342_v55  ;;  %v362_v60 = vmul.f32 %v600_v38, %v361_v56 }
  0x6c   : > { %v373_v61 = vrot.slane %v346_v59, 4  ;;  %v356_v62 = vsel %vm355_vm13, %v598_v35, %v352_v57 }
  0x6d   : > { %v366_v63 = vsel %vm365_vm9, %v600_v38, %v362_v60 }
  0x6e   : > { %v374_v0 = vrot.slane %v366_v63, 4  ;;  %v375_v1 = vsel %vm224_vm0, %v336_v58, %v373_v61 }
  0x6f   : > { %v379_v2 = vmul.f32 %v375_v1, %v834_v52 }
  0x70   : > { %v376_v3 = vsel %vm224_vm0, %v356_v62, %v374_v0 }
  0x71   : > { %v380_v4 = vmul.f32 %v376_v3, %v836_v53 }
  0x94   : > { %v384_v7 = vpop.permute.xlu0 %383 }
  0x95   : > { %v388_v9 = vperm.slane %v384_v7, %v387_v8 }
  0x97   : > { %v390_v11 = vmul.f32 %v388_v9, %v379_v2  ;;  %v391_v12 = vmul.f32 %v388_v9, %v380_v4 }
  0x9c   : > { %v395_v10 = vpop.permute.xlu0 %394 }
  0x9d   : > { %v399_v52 = vperm.slane %v395_v10, %v387_v8 }
  0x9f   : > { %v401_v53 = vadd.f32 %v399_v52, %v390_v11  ;;  %v402_v13 = vadd.f32 %v399_v52, %v391_v12 }
  0xa1   : > { %403 = vst [vmem:[%s206_s6] sm:$0xff] %v401_v53 }
  0xa2   : > { %404 = vst [vmem:[%s206_s6 + $0x8] sm:$0xff] %v402_v13 }
  0xa3   : > { %658 = shalt.err (!%p655_p13)
}
  0xa4   : > { %527 = dma.vmem_to_hbm [thread:$0]  (%p789_p9), %s422_s7, 256, %s424_s8, %s406_s15  }
  0xa5 PF: > { %s435_s11 = sand.u32 1, %s693_s12   ;;  %p534_p0 = pnand %p511_p12, %p796_p11 }
  0xa6   : > { %s436_s28 = scalar_lea.sflag [#allocation4], %s435_s11 }
  0xa7   : > { %p535_p1 = pneg %p534_p0 }
  0xa9   : > { %688 = dma.done.wait (%p535_p1), %s436_s28, 256  }
  0xaa   : > { %690 = vsyncadd (%p535_p1), %s436_s28, 4294967040  ;;  %s19_s17 = sadd.s32 1, %s713_s17   ;;  %s906_s12 = smov %s697_s13 }
  0xab   : > { %p16_p2 = scmp.ge.s32.totalorder %s19_s17, 4   ;;  %s907_s13 = smov %s701_s14 }
  0xac   : > { %s908_s14 = smov %s794_s26  ;;  %s909_s15 = smov %s709_s16 }
  0xad   : > { %s910_s16 = smov %s912_s20  ;;  %18 = sbr.rel (!%p16_p2) target bundleno = 6 (0x6), region = 79 }
  0xb2   :  { %442 = vsyncpa [#allocation3], 1 }
  0xb3   :  { %444 = vsyncpa [#allocation3 + $0x1], 1 }
  0xb4   :  { %445 = vsyncpa [#allocation4], 1 }
  0xb5   :  { %447 = vsyncpa [#allocation4 + $0x1], 1 }

</bundles_post_ra>
